<compile_context>
chip_gen: v7x
topology: tpu7x:2x2x1
jax: 0.10.0
libtpu: 0.0.40
codegen_flags: <defaults>
</compile_context>

<pallas_src>
import functools

import jax
import jax.numpy as jnp
from jax.experimental import pallas as pl
from jax.experimental.pallas import tpu as pltpu

_LANES = 128
_SUBLANES = 8
_MAX_BLOCK_ROWS = 4096  # (4096, 128) f32 = 2 MiB per input per pipeline buffer


def _l1_kernel(x_ref, t_ref, o_ref, acc_ref, *, n_blocks, block_rows,
               tail_valid_rows, tail_partial):
    """Streaming reduction of sum(|t - sigmoid(x)|) into an (8,128) VMEM acc."""
    j = pl.program_id(0)

    @pl.when(j == 0)
    def _():
        acc_ref[...] = jnp.zeros_like(acc_ref)

    def accumulate(mask_rows):
        x = x_ref[...].astype(jnp.float32)
        t = t_ref[...].astype(jnp.float32)
        # sigmoid(x) == 0.5 * tanh(0.5 * x) + 0.5 -> single EUP transcendental.
        rec = 0.5 * jnp.tanh(0.5 * x) + 0.5
        diff = jnp.abs(t - rec)
        if mask_rows is not None:
            # Zero rows past the logical end of the slab: the partial last
            # Pallas block delivers unspecified data there.
            row = jax.lax.broadcasted_iota(jnp.int32, diff.shape, 0)
            diff = jnp.where(row < mask_rows, diff, 0.0)
        # Sublane fold: keep the accumulator a single (8,128) vreg so the
        # per-step acc load/store does not scale with block_rows.
        acc_ref[...] += diff.reshape(block_rows // _SUBLANES, _SUBLANES,
                                     _LANES).sum(axis=0)

    if tail_partial:
        # Interior blocks take the mask-free (pure HBM-streaming) path.
        @pl.when(j < n_blocks - 1)
        def _():
            accumulate(None)

        @pl.when(j == n_blocks - 1)
        def _():
            accumulate(tail_valid_rows)
    else:
        accumulate(None)

    @pl.when(j == n_blocks - 1)
    def _():
        # Single epilogue cross-lane/sublane reduce + scalar SMEM write.
        o_ref[0, 0] = jnp.sum(acc_ref[...])


@functools.partial(jax.jit, static_argnames=("size_average", "max_block_rows"))
def l1_loss(input_, target, size_average=True, max_block_rows=_MAX_BLOCK_ROWS):
    """Pallas TPU implementation of L1Loss.forward."""
    assert input_.shape == target.shape
    assert max_block_rows % _SUBLANES == 0
    numel = input_.size

    x_flat = input_.reshape(-1)
    t_flat = target.reshape(-1)

    # Pad to a multiple of 8*128 = 1024 elements so the flat array forms a
    # lane-dense (rows, 128) slab with rows % 8 == 0.  Padded elements are
    # x = -100 / t = 0, for which |t - sigmoid(x)| == 0 exactly, so the
    # padding contributes nothing and needs no in-kernel mask.  Pad <= 1023.
    pad = (-numel) % (_SUBLANES * _LANES)
    if pad:
        x_flat = jnp.pad(x_flat, (0, pad), constant_values=-100.0)
        t_flat = jnp.pad(t_flat, (0, pad), constant_values=0.0)
    rows = (numel + pad) // _LANES  # multiple of 8

    block_rows = min(max_block_rows, rows)
    n_blocks = (rows + block_rows - 1) // block_rows
    tail_valid_rows = rows - (n_blocks - 1) * block_rows
    tail_partial = tail_valid_rows != block_rows

    x2d = x_flat.reshape(rows, _LANES)
    t2d = t_flat.reshape(rows, _LANES)

    kernel = functools.partial(
        _l1_kernel,
        n_blocks=n_blocks,
        block_rows=block_rows,
        tail_valid_rows=tail_valid_rows,
        tail_partial=tail_partial,
    )

    out = pl.pallas_call(
        kernel,
        out_shape=jax.ShapeDtypeStruct((1, 1), jnp.float32),
        grid_spec=pltpu.PrefetchScalarGridSpec(
            num_scalar_prefetch=0,
            grid=(n_blocks,),
            in_specs=[
                pl.BlockSpec((block_rows, _LANES), lambda j: (j, 0)),
                pl.BlockSpec((block_rows, _LANES), lambda j: (j, 0)),
            ],
            out_specs=pl.BlockSpec((1, 1), lambda j: (0, 0),
                                   memory_space=pltpu.MemorySpace.SMEM),
            scratch_shapes=[pltpu.VMEM((_SUBLANES, _LANES), jnp.float32)],
        ),
        compiler_params=pltpu.CompilerParams(
            dimension_semantics=("arbitrary",)),
    )(x2d, t2d)

    loss = out[0, 0]
    if size_average:
        loss = loss / jnp.float32(numel)
    return loss


def _reference(input_, target, size_average=True):
    rec = jax.nn.sigmoid(input_.astype(jnp.float32))
    loss = jnp.sum(jnp.abs(target.astype(jnp.float32) - rec))
    if size_average:
        loss = loss / input_.size
    return loss


if __name__ == "__main__":
    key = jax.random.PRNGKey(0)
    k1, k2 = jax.random.split(key)
    # NCHW, small shapes consistent with an autoencoder-style reconstruction loss
    x = jax.random.normal(k1, (2, 4, 16, 16), dtype=jnp.float32)
    t = jax.random.uniform(k2, (2, 4, 16, 16), dtype=jnp.float32)

    out = l1_loss(x, t, size_average=True)
    jax.block_until_ready(out)
    ref = _reference(x, t, size_average=True)
    assert jnp.allclose(out, ref, rtol=1e-5, atol=1e-6), (out, ref)

    # size_average=False path
    out2 = l1_loss(x, t, size_average=False)
    jax.block_until_ready(out2)
    ref2 = _reference(x, t, size_average=False)
    assert jnp.allclose(out2, ref2, rtol=1e-5, atol=1e-4), (out2, ref2)

    # Ragged-size input (exercises the wrapper pad path).
    k3, k4 = jax.random.split(k2)
    xr = jax.random.normal(k3, (3, 5, 17, 13), dtype=jnp.float32)
    tr = jax.random.uniform(k4, (3, 5, 17, 13), dtype=jnp.float32)
    out3 = l1_loss(xr, tr, size_average=True)
    jax.block_until_ready(out3)
    ref3 = _reference(xr, tr, size_average=True)
    assert jnp.allclose(out3, ref3, rtol=1e-5, atol=1e-6), (out3, ref3)

    # Forced small tiles: multi-block reduction + partial last block
    # (exercises the accumulator carry and the hoisted tail-row mask).
    out4 = l1_loss(xr, tr, size_average=True, max_block_rows=24)
    jax.block_until_ready(out4)
    assert jnp.allclose(out4, ref3, rtol=1e-5, atol=1e-6), (out4, ref3)

    # bf16 streaming path (no wrapper f32 cast).
    out5 = l1_loss(x.astype(jnp.bfloat16), t.astype(jnp.bfloat16),
                   size_average=True)
    jax.block_until_ready(out5)
    ref5 = _reference(x.astype(jnp.bfloat16), t.astype(jnp.bfloat16), True)
    assert jnp.allclose(out5, ref5, rtol=1e-3, atol=1e-3), (out5, ref5)

    print("KERNEL_OK")
</pallas_src>

<mosaic_0001>
module attributes {stable_mosaic.version = 11 : i64} {
  func.func @_l1_kernel(%arg0: i32, %arg1: memref<16x128xf32, #tpu.memory_space<vmem>>, %arg2: memref<16x128xf32, #tpu.memory_space<vmem>>, %arg3: memref<1x1xf32, #tpu.memory_space<smem>>, %arg4: memref<8x128xf32, #tpu.memory_space<vmem>>) attributes {dimension_semantics = [#tpu.dimension_semantics<arbitrary>], iteration_bounds = array<i64: 1>, scalar_prefetch = 0 : i64, scratch_operands = 1 : i64, tpu.core_type = #tpu.core_type<tc>, window_params = [{transform_indices = @transform_0, window_bounds = array<i64: 16, 128>}, {transform_indices = @transform_1, window_bounds = array<i64: 16, 128>}, {transform_indices = @transform_2, window_bounds = array<i64: 1, 1>}]} {
    %c0_i32 = arith.constant 0 : i32
    %0 = arith.cmpi eq, %arg0, %c0_i32 : i32
    %1 = arith.extui %0 : i1 to i32
    %c0_i32_0 = arith.constant 0 : i32
    %2 = arith.cmpi ne, %1, %c0_i32_0 : i32
    scf.if %2 {
      %cst_13 = arith.constant 0.000000e+00 : f32
      %22 = vector.broadcast %cst_13 : f32 to vector<8x128xf32>
      %c0_14 = arith.constant 0 : index
      %c0_15 = arith.constant 0 : index
      %23 = vector.load %arg4[%c0_14, %c0_15] : memref<8x128xf32, #tpu.memory_space<vmem>>, vector<8x128xf32>
      tpu.vector_store %arg4[%c0_14, %c0_15], %22 {strides = array<i32>} : memref<8x128xf32, #tpu.memory_space<vmem>>, vector<8x128xf32>,
    } else {
    }
    %c0 = arith.constant 0 : index
    %c0_1 = arith.constant 0 : index
    %3 = vector.load %arg1[%c0, %c0_1] : memref<16x128xf32, #tpu.memory_space<vmem>>, vector<16x128xf32>
    %c0_2 = arith.constant 0 : index
    %c0_3 = arith.constant 0 : index
    %4 = vector.load %arg2[%c0_2, %c0_3] : memref<16x128xf32, #tpu.memory_space<vmem>>, vector<16x128xf32>
    %cst = arith.constant 5.000000e-01 : f32
    %5 = vector.broadcast %cst : f32 to vector<16x128xf32>
    %6 = arith.mulf %5, %3 : vector<16x128xf32>
    %7 = math.tanh %6 : vector<16x128xf32>
    %cst_4 = arith.constant 5.000000e-01 : f32
    %8 = vector.broadcast %cst_4 : f32 to vector<16x128xf32>
    %9 = arith.mulf %8, %7 : vector<16x128xf32>
    %cst_5 = arith.constant 5.000000e-01 : f32
    %10 = vector.broadcast %cst_5 : f32 to vector<16x128xf32>
    %11 = arith.addf %9, %10 : vector<16x128xf32>
    %12 = arith.subf %4, %11 : vector<16x128xf32>
    %13 = math.absf %12 : vector<16x128xf32>
    %c0_6 = arith.constant 0 : index
    %c0_7 = arith.constant 0 : index
    %14 = vector.load %arg4[%c0_6, %c0_7] : memref<8x128xf32, #tpu.memory_space<vmem>>, vector<8x128xf32>
    %15 = vector.shape_cast %13 : vector<16x128xf32> to vector<2x8x128xf32>
    %cst_8 = arith.constant dense<0.000000e+00> : vector<8x128xf32>
    %16 = vector.multi_reduction <add>, %15, %cst_8 [0] : vector<2x8x128xf32> to vector<8x128xf32>
    %17 = arith.addf %14, %16 : vector<8x128xf32>
    %c0_9 = arith.constant 0 : index
    %c0_10 = arith.constant 0 : index
    %18 = vector.load %arg4[%c0_9, %c0_10] : memref<8x128xf32, #tpu.memory_space<vmem>>, vector<8x128xf32>
    tpu.vector_store %arg4[%c0_9, %c0_10], %17 {strides = array<i32>} : memref<8x128xf32, #tpu.memory_space<vmem>>, vector<8x128xf32>,
    %c0_i32_11 = arith.constant 0 : i32
    %19 = arith.cmpi eq, %arg0, %c0_i32_11 : i32
    %20 = arith.extui %19 : i1 to i32
    %c0_i32_12 = arith.constant 0 : i32
    %21 = arith.cmpi ne, %20, %c0_i32_12 : i32
    scf.if %21 {
      %c0_13 = arith.constant 0 : index
      %c0_14 = arith.constant 0 : index
      %22 = vector.load %arg4[%c0_13, %c0_14] : memref<8x128xf32, #tpu.memory_space<vmem>>, vector<8x128xf32>
      %23 = vector.shape_cast %22 : vector<8x128xf32> to vector<1x8x128xf32>
      %cst_15 = arith.constant dense<0.000000e+00> : vector<1xf32>
      %24 = vector.multi_reduction <add>, %23, %cst_15 [1, 2] : vector<1x8x128xf32> to vector<1xf32>
      %25 = vector.shape_cast %24 : vector<1xf32> to vector<1x1x1xf32>
      %26 = vector.extract %25[0, 0, 0] : f32 from vector<1x1x1xf32>
      %c0_16 = arith.constant 0 : index
      %c0_17 = arith.constant 0 : index
      %27 = memref.load %arg3[%c0_16, %c0_17] : memref<1x1xf32, #tpu.memory_space<smem>>
      memref.store %26, %arg3[%c0_16, %c0_17] : memref<1x1xf32, #tpu.memory_space<smem>>
    } else {
    }
    return
  }
  func.func @transform_0(%arg0: i32) -> (i32, i32) {
    %c0_i32 = arith.constant 0 : i32
    %c0_i32_0 = arith.constant 0 : i32
    return %arg0, %c0_i32 : i32, i32
  }
  func.func @transform_1(%arg0: i32) -> (i32, i32) {
    %c0_i32 = arith.constant 0 : i32
    %c0_i32_0 = arith.constant 0 : i32
    return %arg0, %c0_i32 : i32, i32
  }
  func.func @transform_2(%arg0: i32) -> (i32, i32) {
    %c0_i32 = arith.constant 0 : i32
    %c0_i32_0 = arith.constant 0 : i32
    %c0_i32_1 = arith.constant 0 : i32
    return %c0_i32, %c0_i32_0 : i32, i32
  }
}

</mosaic_0001>

<bundles_post_ra>
// kernel: l1_loss.1
= control target key start
LH: loop header
LB: loop body
LE: loop exit
PB: predicated region body
PF: predicated region fallthrough
CT: control target
= control target key end

     0   :  { %s124_s0 = inlined_call_operand.vmem [shape: f32[16,128], index: 0, kind: input, shape index: {}]   ;;  %s125_s1 = inlined_call_operand.vmem [shape: f32[16,128], index: 1, kind: input, shape index: {}]   ;;  %s126_s2 = inlined_call_operand.hbm [shape: f32[1,1], index: 2, kind: output, shape index: {}]  }
   0x1   :  { %v17_v0 = vld [vmem:[%s124_s0] sm:$0xff]  ;;  %v18_v1 = vld [vmem:[%s124_s0 + $0x8] sm:$0xff] }
   0x2   :  { %v21_v2 = vmul.f32 0.5, %v17_v0  ;;  %v22_v3 = vmul.f32 0.5, %v18_v1 }
   0x3   :  { %7 = vsyncpa [#allocation4], 0  ;;  %v19_v7 = vld [vmem:[%s125_s1] sm:$0xff]  ;;  %v20_v9 = vld [vmem:[%s125_s1 + $0x8] sm:$0xff]  ;;  %s72_s18 = scalar_lea.hbm %s126_s2, 16 }
   0x4   :  { %68 = vtanh.f32 %v21_v2  ;;  %p73_p0 = scmp.ne.s32.totalorder %s126_s2, %s72_s18  ;;  %p76_p1 = scmp.lt.u32.totalorder %s72_s18, %s126_s2 }
   0x5   :  { %70 = vtanh.f32 %v22_v3 }
   0x6   :  { %p78_p2 = pnand %p76_p1, %p73_p0 }
   0xe   :  { %v69_v4 = vpop.eup %68 }
   0xf   :  { %v71_v5 = vpop.eup %70  ;;  %v25_v6 = vmul.f32 0.5, %v69_v4 }
  0x10   :  { %v26_v8 = vmul.f32 0.5, %v71_v5 }
  0x11   :  { %v27_v10 = vadd.f32 0.5, %v25_v6 }
  0x12   :  { %v28_v11 = vadd.f32 0.5, %v26_v8 }
  0x13   :  { %v29_v12 = vsub.f32 %v19_v7, %v27_v10 }
  0x14   :  { %v30_v13 = vsub.f32 %v20_v9, %v28_v11 }
  0x15   :  { %v31_v14 = vand.u32 2147483647, %v29_v12 }
  0x16   :  { %v32_v15 = vand.u32 2147483647, %v30_v13 }
  0x18   :  { %v34_v16 = vadd.f32 %v32_v15, %v31_v14 }
  0x1a   :  { %41 = vadd.xlane.f32.xlu0 %v34_v16 }
  0xa7   :  { %v42_v17 = vpop.xlane.xlu0 %41 }
  0xa8   :  { %v43_v18 = vrot.slane %v42_v17, 4 }
  0xaa   :  { %v44_v19 = vadd.f32 %v43_v18, %v42_v17 }
  0xac   :  { %v45_v20 = vrot.slane %v44_v19, 2 }
  0xae   :  { %v46_v21 = vadd.f32 %v45_v20, %v44_v19 }
  0xb0   :  { %v47_v22 = vrot.slane %v46_v21, 1 }
  0xb2   :  { %v48_v23 = vadd.f32 %v47_v22, %v46_v21 }
  0xb4   :  { %65 = vpush %v48_v23 }
  0xe5   :  { %s66_s0 = spop %65 }
  0xe6   :  { %51 = sst [smem:[#allocation3]] %s66_s0 }
  0xe7   :  { %81 = shalt.err (!%p78_p2)
}
  0xe8   :  { %s84_s23 = smov [#allocation3]  }
  0xe9   :  { %59 = dma.smem_to_hbm %s84_s23, 16, %s126_s2, [#allocation4]  }
  0xea   :  { %82 = dma.done.wait [#allocation4], 16  }
  0xeb   :  { %83 = vsyncadd [#allocation4], 4294967280 }
  0xec   :  { %63 = sfence }
  0xed   :  { %64 = vsyncpa [#allocation4], 1 }

</bundles_post_ra>
